<compile_context>
chip_gen: v7x
topology: tpu7x:2x2x1
jax: 0.10.0
libtpu: 0.0.40
codegen_flags: <defaults>
</compile_context>

<pallas_src>
import jax
import jax.numpy as jnp
from jax.experimental import pallas as pl
from jax.experimental.pallas import tpu as pltpu


def embed_kernel(xp_ref, w_ref, add_ref, o_ref):
    # xp_ref : (tb, seq_pad, Kpad) bf16  zero cls row + zero seq/K padding
    # w_ref  : (Kpad, dim)         bf16  conv weight reshaped/transposed, K zero-padded
    # add_ref: (seq_pad, dim)      f32   row0 = cls+pos[0]; rows 1..N = pos+bias; pad rows 0
    # o_ref  : (tb, seq_pad, dim)        output block (aligned full-block store)
    tb, seq_pad, kpad = xp_ref.shape
    dim = w_ref.shape[1]

    # seq_pad % 16 == 0 and Kpad % 128 == 0  ->  this collapse is a free view.
    a = xp_ref[...].reshape(tb * seq_pad, kpad)                        # bf16
    # One MXU matmul per grid step, f32 accumulation.
    y = jnp.dot(a, w_ref[...], preferred_element_type=jnp.float32)     # (tb*seq_pad, dim) f32
    # seq_pad % 8 == 0  ->  free view; f32 epilogue, broadcast fused add over tb.
    y = y.reshape(tb, seq_pad, dim) + add_ref[...][None]
    # Single aligned, lane-dense store of the whole block.
    o_ref[...] = y.astype(o_ref.dtype)


def vit_embedding(x, conv_w, conv_b, cls_token, pos_emb, patch_size,
                  batch_tile=None, out_dtype=jnp.bfloat16,
                  vmem_budget_bytes=24 * 1024 * 1024):
    """x: (B, C, H, W) NCHW, conv_w: (dim, C, P, P), conv_b: (dim,),
    cls_token: (1, 1, dim), pos_emb: (1, N+1, dim).  Returns (B, N+1, dim)."""
    B, C, H, W = x.shape
    P = patch_size
    nH, nW = H // P, W // P
    N = nH * nW
    seq = N + 1
    dim = conv_w.shape[0]
    K = C * P * P
    Kpad = ((K + 127) // 128) * 128          # multiple of 128 (MXU K granularity)
    seq_pad = ((seq + 15) // 16) * 16        # multiple of 16: bf16 input & f32/bf16 output views free
    out_bytes = jnp.dtype(out_dtype).itemsize

    # ---- layout glue (reshape/transpose/pad/cast) stays in XLA -------------------
    # Cast to bf16 BEFORE the transpose so the transposed intermediate is bf16 and
    # the pre-pass fuses into one pass over x (no materialized f32 transpose).
    xp = (x.astype(jnp.bfloat16)
            .reshape(B, C, nH, P, nW, P)
            .transpose(0, 2, 4, 1, 3, 5)
            .reshape(B, N, K))                                         # (B, N, K) bf16
    # Prepend a zero row (becomes the cls row after the matmul), append zero rows up
    # to seq_pad (sliced off below), zero-pad K -> Kpad for aligned unmasked loads.
    xp_ext = jnp.pad(xp, ((0, 0), (1, seq_pad - seq), (0, Kpad - K)))  # (B, seq_pad, Kpad)
    w_mat = jnp.pad(conv_w.reshape(dim, K).T.astype(jnp.bfloat16),
                    ((0, Kpad - K), (0, 0)))                           # (Kpad, dim) bf16
    # Fused f32 additive term: row0 = cls+pos[0]; rows 1..N = pos[1:]+bias; pad rows 0.
    add_core = jnp.concatenate(
        [cls_token[0, :, :] + pos_emb[0, :1, :],
         pos_emb[0, 1:, :] + conv_b[None, :]], axis=0).astype(jnp.float32)
    add_term = jnp.pad(add_core, ((0, seq_pad - seq), (0, 0)))         # (seq_pad, dim) f32

    # ---- batch tile: largest divisor of B whose pipelined blocks fit the budget --
    weight_bytes = Kpad * dim * 2                            # bf16, single-buffered
    add_bytes = seq_pad * dim * 4                            # f32,  single-buffered
    per_img_bytes = seq_pad * (Kpad * 2 + dim * out_bytes)   # patch block + output block
    if batch_tile is None:
        # Keep enough grid blocks to hide prologue/epilogue DMAs behind compute
        # (>= ~8 blocks == >= 4 per v7x TensorCore) when the batch size allows it.
        if B >= 32:
            min_blocks = 8
        elif B >= 8:
            min_blocks = 4
        else:
            min_blocks = 1
        tb = 1
        for cand in range(1, B + 1):
            if B % cand:
                continue
            if B // cand < min_blocks:
                continue
            if weight_bytes + add_bytes + 2 * cand * per_img_bytes <= vmem_budget_bytes:
                tb = cand
    else:
        tb = batch_tile
    grid = (B // tb,)

    # Explicit scoped-VMEM limit sized to the chosen tile (+ headroom for compiler
    # scratch / fallback double-buffering); stays well under v7x's 64 MiB physical.
    footprint = weight_bytes + add_bytes + 2 * tb * per_img_bytes
    vmem_limit = min(60 * 1024 * 1024, int(footprint * 1.5) + (4 << 20))

    def _call(single_buffer_invariant):
        inv_kw = ({"pipeline_mode": pl.Buffered(1)}
                  if single_buffer_invariant else {})
        grid_spec = pltpu.PrefetchScalarGridSpec(
            num_scalar_prefetch=0,
            grid=grid,
            in_specs=[
                # patch blocks stream with the grid
                pl.BlockSpec((tb, seq_pad, Kpad), lambda b: (b, 0, 0)),
                # grid-invariant operands: fetched once, single-buffered
                pl.BlockSpec((Kpad, dim), lambda b: (0, 0), **inv_kw),
                pl.BlockSpec((seq_pad, dim), lambda b: (0, 0), **inv_kw),
            ],
            out_specs=pl.BlockSpec((tb, seq_pad, dim), lambda b: (b, 0, 0)),
        )
        return pl.pallas_call(
            embed_kernel,
            out_shape=jax.ShapeDtypeStruct((B, seq_pad, dim), out_dtype),
            grid_spec=grid_spec,
            compiler_params=pltpu.CompilerParams(
                dimension_semantics=("parallel",),
                vmem_limit_bytes=vmem_limit),
        )(xp_ext, w_mat, add_term)

    try:
        out_pad = _call(True)
    except Exception:
        # Fallback for JAX versions without BlockSpec(pipeline_mode=pl.Buffered(1)):
        # default double-buffering of the grid-invariant operands (slightly more VMEM).
        out_pad = _call(False)

    # Drop the zero seq-padding rows.  Dropout(drop_ratio=0.0) is the identity.
    return out_pad[:, :seq, :]


if __name__ == "__main__":
    # Small shapes consistent with the module:
    # image_channels=3, image_size=32, patch_size=8, dim=128 -> num_patches=16, seq=17
    B, C, IMG, P, DIM = 2, 3, 32, 8, 128
    N = (IMG // P) ** 2

    key = jax.random.PRNGKey(0)
    kx, kw, kb, kc, kp = jax.random.split(key, 5)
    x = jax.random.normal(kx, (B, C, IMG, IMG), dtype=jnp.float32)
    conv_w = jax.random.normal(kw, (DIM, C, P, P), dtype=jnp.float32) * 0.02
    conv_b = jax.random.normal(kb, (DIM,), dtype=jnp.float32) * 0.02
    # (PyTorch inits cls_token / pos_emb to zeros; use deterministic randoms to
    # exercise the add path.)
    cls_token = jax.random.normal(kc, (1, 1, DIM), dtype=jnp.float32) * 0.02
    pos_emb = jax.random.normal(kp, (1, N + 1, DIM), dtype=jnp.float32) * 0.02

    out = vit_embedding(x, conv_w, conv_b, cls_token, pos_emb, P)
    out = jax.block_until_ready(out)
    assert out.shape == (B, N + 1, DIM)
    out_f32 = out.astype(jnp.float32)

    # Pure-JAX f32 reference (same math as the PyTorch forward).
    xp_r = (x.reshape(B, C, IMG // P, P, IMG // P, P)
              .transpose(0, 2, 4, 1, 3, 5)
              .reshape(B, N, C * P * P))
    ref_patches = jnp.einsum("bnk,kd->bnd", xp_r, conv_w.reshape(DIM, -1).T) + conv_b
    ref = jnp.concatenate(
        [jnp.broadcast_to(cls_token, (B, 1, DIM)), ref_patches], axis=1) + pos_emb

    # cls row: zero row @ W == 0 exactly, f32 add; only the bf16 output store rounds.
    assert jnp.allclose(out_f32[:, 0, :],
                        (cls_token[0, 0] + pos_emb[0, 0])[None, :],
                        atol=2e-3, rtol=0), "cls row mismatch"
    # Patch rows: bf16 matmul operands, f32 accumulation, bf16 store vs f32 reference.
    max_err = float(jnp.max(jnp.abs(out_f32 - ref)))
    assert jnp.allclose(out_f32, ref, atol=3e-2, rtol=3e-2), max_err

    print("KERNEL_OK")
</pallas_src>

<mosaic_0001>
module attributes {stable_mosaic.version = 11 : i64} {
  func.func @embed_kernel(%arg0: i32, %arg1: memref<2x32x256xbf16, #tpu.memory_space<vmem>>, %arg2: memref<256x128xbf16, #tpu.memory_space<vmem>>, %arg3: memref<32x128xf32, #tpu.memory_space<vmem>>, %arg4: memref<2x32x128xbf16, #tpu.memory_space<vmem>>) attributes {dimension_semantics = [#tpu.dimension_semantics<parallel>], iteration_bounds = array<i64: 1>, scalar_prefetch = 0 : i64, scratch_operands = 0 : i64, tpu.core_type = #tpu.core_type<tc>, window_params = [{transform_indices = @transform_0, window_bounds = array<i64: 2, 32, 256>}, {pipeline_mode = #tpu.pipeline_mode<synchronous>, transform_indices = @transform_1, window_bounds = array<i64: 256, 128>}, {pipeline_mode = #tpu.pipeline_mode<synchronous>, transform_indices = @transform_2, window_bounds = array<i64: 32, 128>}, {transform_indices = @transform_3, window_bounds = array<i64: 2, 32, 128>}]} {
    %c0 = arith.constant 0 : index
    %c0_0 = arith.constant 0 : index
    %c0_1 = arith.constant 0 : index
    %0 = vector.load %arg1[%c0, %c0_0, %c0_1] : memref<2x32x256xbf16, #tpu.memory_space<vmem>>, vector<2x32x256xbf16>
    %1 = vector.shape_cast %0 : vector<2x32x256xbf16> to vector<64x256xbf16>
    %c0_2 = arith.constant 0 : index
    %c0_3 = arith.constant 0 : index
    %2 = vector.load %arg2[%c0_2, %c0_3] : memref<256x128xbf16, #tpu.memory_space<vmem>>, vector<256x128xbf16>
    %cst = arith.constant dense<0.000000e+00> : vector<64x128xf32>
    %3 = tpu.matmul %1, %2, %cst {dimension_numbers = #tpu.dot_dimension_numbers<[1], [0], [0], [1], [0, 0, 1, 1], [], []>} : vector<64x256xbf16>, vector<256x128xbf16>, vector<64x128xf32> -> vector<64x128xf32>
    %4 = vector.shape_cast %3 : vector<64x128xf32> to vector<2x32x128xf32>
    %c0_4 = arith.constant 0 : index
    %c0_5 = arith.constant 0 : index
    %5 = vector.load %arg3[%c0_4, %c0_5] : memref<32x128xf32, #tpu.memory_space<vmem>>, vector<32x128xf32>
    %6 = vector.shape_cast %5 : vector<32x128xf32> to vector<1x32x128xf32>
    %7 = vector.broadcast %6 : vector<1x32x128xf32> to vector<2x32x128xf32>
    %8 = arith.addf %4, %7 : vector<2x32x128xf32>
    %9 = arith.truncf %8 : vector<2x32x128xf32> to vector<2x32x128xbf16>
    %c0_6 = arith.constant 0 : index
    %c0_7 = arith.constant 0 : index
    %c0_8 = arith.constant 0 : index
    %10 = vector.load %arg4[%c0_6, %c0_7, %c0_8] : memref<2x32x128xbf16, #tpu.memory_space<vmem>>, vector<2x32x128xbf16>
    tpu.vector_store %arg4[%c0_6, %c0_7, %c0_8], %9 {strides = array<i32>} : memref<2x32x128xbf16, #tpu.memory_space<vmem>>, vector<2x32x128xbf16>,
    return
  }
  func.func @transform_0(%arg0: i32) -> (i32, i32, i32) {
    %c0_i32 = arith.constant 0 : i32
    %c0_i32_0 = arith.constant 0 : i32
    %c0_i32_1 = arith.constant 0 : i32
    return %arg0, %c0_i32, %c0_i32_0 : i32, i32, i32
  }
  func.func @transform_1(%arg0: i32) -> (i32, i32) {
    %c0_i32 = arith.constant 0 : i32
    %c0_i32_0 = arith.constant 0 : i32
    %c0_i32_1 = arith.constant 0 : i32
    return %c0_i32, %c0_i32_0 : i32, i32
  }
  func.func @transform_2(%arg0: i32) -> (i32, i32) {
    %c0_i32 = arith.constant 0 : i32
    %c0_i32_0 = arith.constant 0 : i32
    %c0_i32_1 = arith.constant 0 : i32
    return %c0_i32, %c0_i32_0 : i32, i32
  }
  func.func @transform_3(%arg0: i32) -> (i32, i32, i32) {
    %c0_i32 = arith.constant 0 : i32
    %c0_i32_0 = arith.constant 0 : i32
    %c0_i32_1 = arith.constant 0 : i32
    return %arg0, %c0_i32, %c0_i32_0 : i32, i32, i32
  }
}

module attributes {stable_mosaic.version = 11 : i64} {
  func.func @embed_kernel(%arg0: i32, %arg1: memref<2x32x256xbf16, #tpu.memory_space<vmem>>, %arg2: memref<256x128xbf16, #tpu.memory_space<vmem>>, %arg3: memref<32x128xf32, #tpu.memory_space<vmem>>, %arg4: memref<2x32x128xbf16, #tpu.memory_space<vmem>>) attributes {dimension_semantics = [#tpu.dimension_semantics<parallel>], iteration_bounds = array<i64: 1>, scalar_prefetch = 0 : i64, scratch_operands = 0 : i64, tpu.core_type = #tpu.core_type<tc>, window_params = [{transform_indices = @transform_0, window_bounds = array<i64: 2, 32, 256>}, {pipeline_mode = #tpu.pipeline_mode<synchronous>, transform_indices = @transform_1, window_bounds = array<i64: 256, 128>}, {pipeline_mode = #tpu.pipeline_mode<synchronous>, transform_indices = @transform_2, window_bounds = array<i64: 32, 128>}, {transform_indices = @transform_3, window_bounds = array<i64: 2, 32, 128>}]} {
    %c0 = arith.constant 0 : index
    %c0_0 = arith.constant 0 : index
    %c0_1 = arith.constant 0 : index
    %0 = vector.load %arg1[%c0, %c0_0, %c0_1] : memref<2x32x256xbf16, #tpu.memory_space<vmem>>, vector<2x32x256xbf16>
    %1 = vector.shape_cast %0 : vector<2x32x256xbf16> to vector<64x256xbf16>
    %c0_2 = arith.constant 0 : index
    %c0_3 = arith.constant 0 : index
    %2 = vector.load %arg2[%c0_2, %c0_3] : memref<256x128xbf16, #tpu.memory_space<vmem>>, vector<256x128xbf16>
    %cst = arith.constant dense<0.000000e+00> : vector<64x128xf32>
    %3 = tpu.matmul %1, %2, %cst {dimension_numbers = #tpu.dot_dimension_numbers<[1], [0], [0], [1], [0, 0, 1, 1], [], []>} : vector<64x256xbf16>, vector<256x128xbf16>, vector<64x128xf32> -> vector<64x128xf32>
    %4 = vector.shape_cast %3 : vector<64x128xf32> to vector<2x32x128xf32>
    %c0_4 = arith.constant 0 : index
    %c0_5 = arith.constant 0 : index
    %5 = vector.load %arg3[%c0_4, %c0_5] : memref<32x128xf32, #tpu.memory_space<vmem>>, vector<32x128xf32>
    %6 = vector.shape_cast %5 : vector<32x128xf32> to vector<1x32x128xf32>
    %7 = vector.broadcast %6 : vector<1x32x128xf32> to vector<2x32x128xf32>
    %8 = arith.addf %4, %7 : vector<2x32x128xf32>
    %9 = arith.truncf %8 : vector<2x32x128xf32> to vector<2x32x128xbf16>
    %c0_6 = arith.constant 0 : index
    %c0_7 = arith.constant 0 : index
    %c0_8 = arith.constant 0 : index
    %10 = vector.load %arg4[%c0_6, %c0_7, %c0_8] : memref<2x32x128xbf16, #tpu.memory_space<vmem>>, vector<2x32x128xbf16>
    tpu.vector_store %arg4[%c0_6, %c0_7, %c0_8], %9 {strides = array<i32>} : memref<2x32x128xbf16, #tpu.memory_space<vmem>>, vector<2x32x128xbf16>,
    return
  }
  func.func @transform_0(%arg0: i32) -> (i32, i32, i32) {
    %c0_i32 = arith.constant 0 : i32
    %c0_i32_0 = arith.constant 0 : i32
    %c0_i32_1 = arith.constant 0 : i32
    return %arg0, %c0_i32, %c0_i32_0 : i32, i32, i32
  }
  func.func @transform_1(%arg0: i32) -> (i32, i32) {
    %c0_i32 = arith.constant 0 : i32
    %c0_i32_0 = arith.constant 0 : i32
    %c0_i32_1 = arith.constant 0 : i32
    return %c0_i32, %c0_i32_0 : i32, i32
  }
  func.func @transform_2(%arg0: i32) -> (i32, i32) {
    %c0_i32 = arith.constant 0 : i32
    %c0_i32_0 = arith.constant 0 : i32
    %c0_i32_1 = arith.constant 0 : i32
    return %c0_i32, %c0_i32_0 : i32, i32
  }
  func.func @transform_3(%arg0: i32) -> (i32, i32, i32) {
    %c0_i32 = arith.constant 0 : i32
    %c0_i32_0 = arith.constant 0 : i32
    %c0_i32_1 = arith.constant 0 : i32
    return %arg0, %c0_i32, %c0_i32_0 : i32, i32, i32
  }
}

</mosaic_0001>

<bundles_post_ra>
// kernel: tpu_custom_call.1
= control target key start
LH: loop header
LB: loop body
LE: loop exit
PB: predicated region body
PF: predicated region fallthrough
CT: control target
= control target key end

     0   :  { %8 = vsyncpa [#allocation3], 0  ;;  %s699_s0 = inlined_call_operand.hbm [shape: bf16[2,32,256], index: 0, kind: input, shape index: {}]   ;;  %s700_s1 = inlined_call_operand.hbm [shape: bf16[256,128], index: 1, kind: input, shape index: {}]   ;;  %s701_s2 = inlined_call_operand.hbm [shape: f32[32,128], index: 2, kind: input, shape index: {}]   ;;  %s702_s3 = inlined_call_operand.hbm [shape: bf16[2,32,128], index: 3, kind: output, shape index: {}]  }
   0x1   :  { %9 = vsyncpa [#allocation6], 0 }
   0x2   :  { %10 = vsyncpa [#allocation4], 0  ;;  %s617_s12 = smov [#allocation5]   ;;  %s523_s16 = scalar_lea.hbm %s700_s1, 2048 }
   0x3   :  { %s28_s13 = sshll.u32 %s617_s12, 4  ;;  %p524_p0 = scmp.ne.s32.totalorder %s700_s1, %s523_s16  ;;  %s29_s13 = int_to_ptr.vmem [resolvable:$true] %s28_s13 }
   0x4   :  { %p527_p1 = scmp.lt.u32.totalorder %s523_s16, %s700_s1 }
   0x6   :  { %p529_p2 = pnand %p527_p1, %p524_p0 }
   0x8   :  { %532 = shalt.err (!%p529_p2)
}
   0x9   :  { %s533_s21 = scalar_lea.vmem %s29_s13, 2048  ;;  %p538_p4 = scmp.lt.s32.totalorder %s29_s13, %s29_s13 }
   0xa   :  { %p534_p3 = scmp.ne.s32.totalorder %s29_s13, %s533_s21  ;;  %p539_p5 = scmp.lt.s32.totalorder %s533_s21, %s533_s21 }
   0xc   :  { %p540_p6 = por %p539_p5, %p538_p4 }
   0xe   :  { %p541_p7 = pnand %p540_p6, %p534_p3 }
  0x10   :  { %544 = shalt.err (!%p541_p7)
}
  0x11   :  { %s618_s22 = smov 64   ;;  %s619_s23 = smov 4  }
  0x12   :  { %34 = dma.hbm_to_vmem [thread:$0]  %s700_s1, 2048, %s29_s13, [#allocation6], %s618_s22, %s618_s22, %s619_s23  }
  0x13   :  { %s620_s26 = smov [#allocation2]   ;;  %s545_s30 = scalar_lea.hbm %s699_s0, 1024 }
  0x14   :  { %s16_s27 = sshll.u32 %s620_s26, 4  ;;  %p546_p8 = scmp.ne.s32.totalorder %s699_s0, %s545_s30  ;;  %s17_s27 = int_to_ptr.vmem [resolvable:$true] %s16_s27 }
  0x15   :  { %p549_p9 = scmp.lt.u32.totalorder %s545_s30, %s699_s0 }
  0x17   :  { %p551_p10 = pnand %p549_p9, %p546_p8 }
  0x19   :  { %554 = shalt.err (!%p551_p10)
}
  0x1a   :  { %s555_s8 = scalar_lea.vmem %s17_s27, 1024  ;;  %p560_p12 = scmp.lt.s32.totalorder %s17_s27, %s17_s27 }
  0x1b   :  { %p556_p11 = scmp.ne.s32.totalorder %s17_s27, %s555_s8  ;;  %p561_p13 = scmp.lt.s32.totalorder %s555_s8, %s555_s8 }
  0x1d   :  { %p562_p0 = por %p561_p13, %p560_p12 }
  0x1f   :  { %p563_p1 = pnand %p562_p0, %p556_p11 }
  0x21   :  { %566 = shalt.err (!%p563_p1)
}
  0x22   :  { %s621_s1 = smov 128   ;;  %s622_s9 = smov 8  }
  0x23   :  { %22 = dma.hbm_to_vmem [thread:$0]  %s699_s0, 1024, %s17_s27, [#allocation3], %s621_s1, %s621_s1, %s622_s9  }
  0x24   :  { %s623_s12 = smov [#allocation7]   ;;  %s567_s16 = scalar_lea.hbm %s701_s2, 512 }
  0x25   :  { %s40_s13 = sshll.u32 %s623_s12, 4  ;;  %p568_p2 = scmp.ne.s32.totalorder %s701_s2, %s567_s16  ;;  %s41_s13 = int_to_ptr.vmem [resolvable:$true] %s40_s13 }
  0x26   :  { %p571_p3 = scmp.lt.u32.totalorder %s567_s16, %s701_s2 }
  0x28   :  { %p573_p4 = pnand %p571_p3, %p568_p2 }
  0x2a   :  { %576 = shalt.err (!%p573_p4)
}
  0x2b   :  { %s577_s21 = scalar_lea.vmem %s41_s13, 512  ;;  %p582_p6 = scmp.lt.s32.totalorder %s41_s13, %s41_s13 }
  0x2c   :  { %p578_p5 = scmp.ne.s32.totalorder %s41_s13, %s577_s21  ;;  %p583_p7 = scmp.lt.s32.totalorder %s577_s21, %s577_s21 }
  0x2e   :  { %p584_p8 = por %p583_p7, %p582_p6 }
  0x30   :  { %p585_p9 = pnand %p584_p8, %p578_p5 }
  0x32   :  { %588 = shalt.err (!%p585_p9)
}
  0x33   :  { %46 = dma.hbm_to_vmem [thread:$0]  %s701_s2, 512, %s41_s13, [#allocation6], %s621_s1, %s621_s1, %s622_s9  }
  0x34   :  { %611 = dma.done.wait [#allocation3], 1024  }
  0x35   :  { %612 = vsyncadd [#allocation3], 4294966272 }
  0x36   :  { %613 = dma.done.wait [#allocation6], 2560  }
  0x37   :  { %614 = vsyncadd [#allocation6], 4294964736  ;;  %v495_v0 = vld [vmem:[#allocation5 + $0x40] sm:$0xff]   ;;  %v497_v2 = vld [vmem:[#allocation5 + $0x48] sm:$0xff]   ;;  %s624_s2 = smov [#allocation8]  }
  0x38   :  { %v496_v1 = vld [vmem:[#allocation5] sm:$0xff]   ;;  %431 = vmatprep.subr.bf16.mxu0 %v495_v0  ;;  %471 = vmatprep.subr.bf16.mxu1 %v495_v0  ;;  %v498_v3 = vld [vmem:[#allocation5 + $0x8] sm:$0xff]   ;;  %v499_v4 = vld [vmem:[#allocation5 + $0x50] sm:$0xff]   ;;  %s355_s25 = sshll.u32 %s624_s2, 4  ;;  %s356_s25 = int_to_ptr.vmem [resolvable:$true] %s355_s25 }
  0x39   :  { %432 = vmatpush3.bf16.msra.mxu0 %v496_v1  ;;  %479 = vmatpush3.bf16.msra.mxu1 %v496_v1  ;;  %v500_v5 = vld [vmem:[#allocation5 + $0x10] sm:$0xff]   ;;  %v501_v6 = vld [vmem:[#allocation5 + $0x58] sm:$0xff]   ;;  %v503_v8 = vld [vmem:[#allocation5 + $0x60] sm:$0xff]   ;;  %s589_s26 = scalar_lea.vmem %s356_s25, 512  ;;  %p594_p11 = scmp.lt.s32.totalorder %s356_s25, %s356_s25 }
  0x3a   :  { %433 = vmatprep.subr.bf16.mxu0 %v497_v2  ;;  %472 = vmatprep.subr.bf16.mxu1 %v497_v2  ;;  %v502_v7 = vld [vmem:[#allocation5 + $0x18] sm:$0xff]   ;;  %v504_v9 = vld [vmem:[#allocation5 + $0x20] sm:$0xff]   ;;  %v505_v10 = vld [vmem:[#allocation5 + $0x68] sm:$0xff]   ;;  %p590_p10 = scmp.ne.s32.totalorder %s356_s25, %s589_s26  ;;  %p595_p12 = scmp.lt.s32.totalorder %s589_s26, %s589_s26 }
  0x3b   :  { %v513_v11 = vld [vmem:[#allocation2 + $0x4] ss:$8 sps:$4 sm:$0xff]   ;;  %v507_v14 = vld [vmem:[#allocation5 + $0x70] sm:$0xff]   ;;  %v509_v16 = vld [vmem:[#allocation5 + $0x78] sm:$0xff]  }
  0x3c   :  { %v516_v12 = vld [vmem:[#allocation2 + $0x24] ss:$8 sps:$4 sm:$0xff]   ;;  %265 = vmatprep.mubr.bf16.mxu0 %v513_v11  ;;  %v508_v15 = vld [vmem:[#allocation5 + $0x30] sm:$0xff]   ;;  %v510_v17 = vld [vmem:[#allocation5 + $0x38] sm:$0xff]   ;;  %p596_p13 = por %p595_p12, %p594_p11 }
  0x3d   :  { %434 = vmatpush3.bf16.msra.mxu0 %v498_v3  ;;  %480 = vmatpush3.bf16.msra.mxu1 %v498_v3  ;;  %v506_v13 = vld [vmem:[#allocation5 + $0x28] sm:$0xff]   ;;  %v517_v20 = vld [vmem:[#allocation2 + $0x14] ss:$8 sps:$4 sm:$0xff]   ;;  %v521_v22 = vld [vmem:[#allocation2 + $0x10] ss:$8 sps:$4 sm:$0xff]  }
  0x3e   :  { %435 = vmatprep.subr.bf16.mxu0 %v499_v4  ;;  %473 = vmatprep.subr.bf16.mxu1 %v499_v4  ;;  %v511_v18 = vld [vmem:[#allocation2] ss:$8 sps:$4 sm:$0xff]   ;;  %v519_v21 = vld [vmem:[#allocation2 + $0x34] ss:$8 sps:$4 sm:$0xff]   ;;  %v522_v23 = vld [vmem:[#allocation2 + $0x30] ss:$8 sps:$4 sm:$0xff]   ;;  %p597_p0 = pnand %p596_p13, %p590_p10 }
  0x3f   :  { %281 = vmatprep.mubr.bf16.mxu1 %v516_v12  ;;  %v514_v19 = vld [vmem:[#allocation2 + $0x20] ss:$8 sps:$4 sm:$0xff]   ;;  %v300_v52 = vld [vmem:[#allocation7 + $0x10] sm:$0xff]  ;;  %v301_v54 = vld [vmem:[#allocation7 + $0x18] sm:$0xff] }
  0x40   :  { %v298_v32 = vld [vmem:[#allocation7] sm:$0xff]  ;;  %v299_v34 = vld [vmem:[#allocation7 + $0x8] sm:$0xff] }
  0x41   :  { %436 = vmatpush3.bf16.msra.mxu0 %v500_v5  ;;  %481 = vmatpush3.bf16.msra.mxu1 %v500_v5 }
  0x42   :  { %437 = vmatprep.subr.bf16.mxu0 %v501_v6  ;;  %474 = vmatprep.subr.bf16.mxu1 %v501_v6 }
  0x45   :  { %438 = vmatpush3.bf16.msra.mxu0 %v502_v7  ;;  %482 = vmatpush3.bf16.msra.mxu1 %v502_v7 }
  0x46   :  { %439 = vmatprep.subr.bf16.mxu0 %v503_v8  ;;  %475 = vmatprep.subr.bf16.mxu1 %v503_v8 }
  0x49   :  { %440 = vmatpush3.bf16.msra.mxu0 %v504_v9  ;;  %483 = vmatpush3.bf16.msra.mxu1 %v504_v9 }
  0x4a   :  { %441 = vmatprep.subr.bf16.mxu0 %v505_v10  ;;  %476 = vmatprep.subr.bf16.mxu1 %v505_v10 }
  0x4d   :  { %442 = vmatpush3.bf16.msra.mxu0 %v506_v13  ;;  %484 = vmatpush3.bf16.msra.mxu1 %v506_v13 }
  0x4e   :  { %443 = vmatprep.subr.bf16.mxu0 %v507_v14  ;;  %477 = vmatprep.subr.bf16.mxu1 %v507_v14 }
  0x51   :  { %444 = vmatpush3.bf16.msra.mxu0 %v508_v15  ;;  %485 = vmatpush3.bf16.msra.mxu1 %v508_v15 }
  0x52   :  { %445 = vmatprep.subr.bf16.mxu0 %v509_v16  ;;  %478 = vmatprep.subr.bf16.mxu1 %v509_v16 }
  0x55   :  { %446 = vmatpush3.bf16.msra.mxu0 %v510_v17  ;;  %486 = vmatpush3.bf16.msra.mxu1 %v510_v17 }
  0x58   :  { %266 = vmatmul.mubr.bf16.vlgmr.msra.gmra.mrb[0].mxu0 %v511_v18  ;;  %282 = vmatmul.mubr.bf16.vlgmr.msra.gmra.mrb[0].mxu1 %v514_v19 }
  0x59   :  { %273 = vmatprep.mubr.bf16.mxu0 %v517_v20  ;;  %289 = vmatprep.mubr.bf16.mxu1 %v519_v21 }
  0x60   :  { %274 = vmatmul.mubr.bf16.gmra.mrb[4].mxu0 %v521_v22  ;;  %290 = vmatmul.mubr.bf16.gmra.mrb[4].mxu1 %v522_v23 }
 0x12b   :  { %v447_v24 = vpop.f32.mrb[0].mxu0  ;;  %v459_v25 = vpop.f32.mrb[0].mxu1 }
 0x12c   :  { %v448_v26 = vpop.f32.mrb[1].mxu0  ;;  %v460_v27 = vpop.f32.mrb[1].mxu1 }
 0x12d   :  { %v449_v28 = vadd.f32 %v448_v26, %v447_v24  ;;  %v461_v29 = vadd.f32 %v460_v27, %v459_v25  ;;  %v450_v30 = vpop.f32.mrb[2].mxu0  ;;  %v462_v31 = vpop.f32.mrb[2].mxu1 }
 0x12e   :  { %v451_v33 = vpop.f32.mrb[3].mxu0  ;;  %v463_v35 = vpop.f32.mrb[3].mxu1 }
 0x12f   :  { %v452_v36 = vadd.f32 %v451_v33, %v450_v30  ;;  %v464_v37 = vadd.f32 %v463_v35, %v462_v31  ;;  %v302_v38 = vadd.f32 %v449_v28, %v298_v32  ;;  %v306_v39 = vadd.f32 %v461_v29, %v298_v32 }
 0x131   :  { %v303_v40 = vadd.f32 %v452_v36, %v299_v34  ;;  %v307_v41 = vadd.f32 %v464_v37, %v299_v34 }
 0x133   :  { %v411_v42 = vpack.c.bf16 %v303_v40, %v302_v38  ;;  %v421_v43 = vpack.c.bf16 %v307_v41, %v306_v39  ;;  %v453_v44 = vpop.f32.mrb[4].mxu0  ;;  %v465_v45 = vpop.f32.mrb[4].mxu1 }
 0x134   :  { %v454_v46 = vpop.f32.mrb[5].mxu0  ;;  %v466_v47 = vpop.f32.mrb[5].mxu1 }
 0x135   :  { %412 = vst [vmem:[#allocation8] sm:$0xff] %v411_v42   ;;  %429 = vst [vmem:[#allocation8 + $0x10] sm:$0xff] %v421_v43   ;;  %v455_v48 = vadd.f32 %v454_v46, %v453_v44  ;;  %v467_v49 = vadd.f32 %v466_v47, %v465_v45  ;;  %v456_v50 = vpop.f32.mrb[6].mxu0  ;;  %v468_v51 = vpop.f32.mrb[6].mxu1 }
 0x136   :  { %v457_v53 = vpop.f32.mrb[7].mxu0  ;;  %v469_v55 = vpop.f32.mrb[7].mxu1 }
 0x137   :  { %v458_v56 = vadd.f32 %v457_v53, %v456_v50  ;;  %v470_v57 = vadd.f32 %v469_v55, %v468_v51  ;;  %v304_v58 = vadd.f32 %v455_v48, %v300_v52  ;;  %v308_v59 = vadd.f32 %v467_v49, %v300_v52 }
 0x139   :  { %v305_v60 = vadd.f32 %v458_v56, %v301_v54  ;;  %v309_v61 = vadd.f32 %v470_v57, %v301_v54 }
 0x13b   :  { %v416_v62 = vpack.c.bf16 %v305_v60, %v304_v58  ;;  %v426_v63 = vpack.c.bf16 %v309_v61, %v308_v59 }
 0x13d   :  { %428 = vst [vmem:[#allocation8 + $0x8] sm:$0xff] %v416_v62   ;;  %430 = vst [vmem:[#allocation8 + $0x18] sm:$0xff] %v426_v63  }
 0x13e   :  { %600 = shalt.err (!%p597_p0)
}
 0x13f   :  { %s601_s29 = scalar_lea.hbm %s702_s3, 512 }
 0x140   :  { %p602_p1 = scmp.ne.s32.totalorder %s702_s3, %s601_s29  ;;  %p605_p2 = scmp.lt.u32.totalorder %s601_s29, %s702_s3 }
 0x142   :  { %p607_p3 = pnand %p605_p2, %p602_p1 }
 0x144   :  { %610 = shalt.err (!%p607_p3)
}
 0x145   :  { %361 = dma.vmem_to_hbm [thread:$0]  %s356_s25, 512, %s702_s3, [#allocation4], %s618_s22, %s618_s22, %s619_s23  }
 0x146   :  { %615 = dma.done.wait [#allocation4], 512  }
 0x147   :  { %616 = vsyncadd [#allocation4], 4294966784 }
 0x148   :  { %365 = vsyncpa [#allocation3], 1 }
 0x149   :  { %366 = vsyncpa [#allocation6], 1 }
 0x14a   :  { %367 = vsyncpa [#allocation4], 1 }

// kernel: tpu_custom_call.1
= control target key start
LH: loop header
LB: loop body
LE: loop exit
PB: predicated region body
PF: predicated region fallthrough
CT: control target
= control target key end

     0   :  { %8 = vsyncpa [#allocation3], 0  ;;  %s699_s0 = inlined_call_operand.hbm [shape: bf16[2,32,256], index: 0, kind: input, shape index: {}]   ;;  %s700_s1 = inlined_call_operand.hbm [shape: bf16[256,128], index: 1, kind: input, shape index: {}]   ;;  %s701_s2 = inlined_call_operand.hbm [shape: f32[32,128], index: 2, kind: input, shape index: {}]   ;;  %s702_s3 = inlined_call_operand.hbm [shape: bf16[2,32,128], index: 3, kind: output, shape index: {}]  }
   0x1   :  { %9 = vsyncpa [#allocation6], 0 }
   0x2   :  { %10 = vsyncpa [#allocation4], 0  ;;  %s617_s12 = smov [#allocation5]   ;;  %s523_s16 = scalar_lea.hbm %s700_s1, 2048 }
   0x3   :  { %s28_s13 = sshll.u32 %s617_s12, 4  ;;  %p524_p0 = scmp.ne.s32.totalorder %s700_s1, %s523_s16  ;;  %s29_s13 = int_to_ptr.vmem [resolvable:$true] %s28_s13 }
   0x4   :  { %p527_p1 = scmp.lt.u32.totalorder %s523_s16, %s700_s1 }
   0x6   :  { %p529_p2 = pnand %p527_p1, %p524_p0 }
   0x8   :  { %532 = shalt.err (!%p529_p2)
}
   0x9   :  { %s533_s21 = scalar_lea.vmem %s29_s13, 2048  ;;  %p538_p4 = scmp.lt.s32.totalorder %s29_s13, %s29_s13 }
   0xa   :  { %p534_p3 = scmp.ne.s32.totalorder %s29_s13, %s533_s21  ;;  %p539_p5 = scmp.lt.s32.totalorder %s533_s21, %s533_s21 }
   0xc   :  { %p540_p6 = por %p539_p5, %p538_p4 }
   0xe   :  { %p541_p7 = pnand %p540_p6, %p534_p3 }
  0x10   :  { %544 = shalt.err (!%p541_p7)
}
  0x11   :  { %s618_s22 = smov 64   ;;  %s619_s23 = smov 4  }
  0x12   :  { %34 = dma.hbm_to_vmem [thread:$0]  %s700_s1, 2048, %s29_s13, [#allocation6], %s618_s22, %s618_s22, %s619_s23  }
  0x13   :  { %s620_s26 = smov [#allocation2]   ;;  %s545_s30 = scalar_lea.hbm %s699_s0, 1024 }
  0x14   :  { %s16_s27 = sshll.u32 %s620_s26, 4  ;;  %p546_p8 = scmp.ne.s32.totalorder %s699_s0, %s545_s30  ;;  %s17_s27 = int_to_ptr.vmem [resolvable:$true] %s16_s27 }
  0x15   :  { %p549_p9 = scmp.lt.u32.totalorder %s545_s30, %s699_s0 }
  0x17   :  { %p551_p10 = pnand %p549_p9, %p546_p8 }
  0x19   :  { %554 = shalt.err (!%p551_p10)
}
  0x1a   :  { %s555_s8 = scalar_lea.vmem %s17_s27, 1024  ;;  %p560_p12 = scmp.lt.s32.totalorder %s17_s27, %s17_s27 }
  0x1b   :  { %p556_p11 = scmp.ne.s32.totalorder %s17_s27, %s555_s8  ;;  %p561_p13 = scmp.lt.s32.totalorder %s555_s8, %s555_s8 }
  0x1d   :  { %p562_p0 = por %p561_p13, %p560_p12 }
  0x1f   :  { %p563_p1 = pnand %p562_p0, %p556_p11 }
  0x21   :  { %566 = shalt.err (!%p563_p1)
}
  0x22   :  { %s621_s1 = smov 128   ;;  %s622_s9 = smov 8  }
  0x23   :  { %22 = dma.hbm_to_vmem [thread:$0]  %s699_s0, 1024, %s17_s27, [#allocation3], %s621_s1, %s621_s1, %s622_s9  }
  0x24   :  { %s623_s12 = smov [#allocation7]   ;;  %s567_s16 = scalar_lea.hbm %s701_s2, 512 }
  0x25   :  { %s40_s13 = sshll.u32 %s623_s12, 4  ;;  %p568_p2 = scmp.ne.s32.totalorder %s701_s2, %s567_s16  ;;  %s41_s13 = int_to_ptr.vmem [resolvable:$true] %s40_s13 }
  0x26   :  { %p571_p3 = scmp.lt.u32.totalorder %s567_s16, %s701_s2 }
  0x28   :  { %p573_p4 = pnand %p571_p3, %p568_p2 }
  0x2a   :  { %576 = shalt.err (!%p573_p4)
}
  0x2b   :  { %s577_s21 = scalar_lea.vmem %s41_s13, 512  ;;  %p582_p6 = scmp.lt.s32.totalorder %s41_s13, %s41_s13 }
  0x2c   :  { %p578_p5 = scmp.ne.s32.totalorder %s41_s13, %s577_s21  ;;  %p583_p7 = scmp.lt.s32.totalorder %s577_s21, %s577_s21 }
  0x2e   :  { %p584_p8 = por %p583_p7, %p582_p6 }
  0x30   :  { %p585_p9 = pnand %p584_p8, %p578_p5 }
  0x32   :  { %588 = shalt.err (!%p585_p9)
}
  0x33   :  { %46 = dma.hbm_to_vmem [thread:$0]  %s701_s2, 512, %s41_s13, [#allocation6], %s621_s1, %s621_s1, %s622_s9  }
  0x34   :  { %611 = dma.done.wait [#allocation3], 1024  }
  0x35   :  { %612 = vsyncadd [#allocation3], 4294966272 }
  0x36   :  { %613 = dma.done.wait [#allocation6], 2560  }
  0x37   :  { %614 = vsyncadd [#allocation6], 4294964736  ;;  %v495_v0 = vld [vmem:[#allocation5 + $0x40] sm:$0xff]   ;;  %v497_v2 = vld [vmem:[#allocation5 + $0x48] sm:$0xff]   ;;  %s624_s2 = smov [#allocation8]  }
  0x38   :  { %v496_v1 = vld [vmem:[#allocation5] sm:$0xff]   ;;  %431 = vmatprep.subr.bf16.mxu0 %v495_v0  ;;  %471 = vmatprep.subr.bf16.mxu1 %v495_v0  ;;  %v498_v3 = vld [vmem:[#allocation5 + $0x8] sm:$0xff]   ;;  %v499_v4 = vld [vmem:[#allocation5 + $0x50] sm:$0xff]   ;;  %s355_s25 = sshll.u32 %s624_s2, 4  ;;  %s356_s25 = int_to_ptr.vmem [resolvable:$true] %s355_s25 }
  0x39   :  { %432 = vmatpush3.bf16.msra.mxu0 %v496_v1  ;;  %479 = vmatpush3.bf16.msra.mxu1 %v496_v1  ;;  %v500_v5 = vld [vmem:[#allocation5 + $0x10] sm:$0xff]   ;;  %v501_v6 = vld [vmem:[#allocation5 + $0x58] sm:$0xff]   ;;  %v503_v8 = vld [vmem:[#allocation5 + $0x60] sm:$0xff]   ;;  %s589_s26 = scalar_lea.vmem %s356_s25, 512  ;;  %p594_p11 = scmp.lt.s32.totalorder %s356_s25, %s356_s25 }
  0x3a   :  { %433 = vmatprep.subr.bf16.mxu0 %v497_v2  ;;  %472 = vmatprep.subr.bf16.mxu1 %v497_v2  ;;  %v502_v7 = vld [vmem:[#allocation5 + $0x18] sm:$0xff]   ;;  %v504_v9 = vld [vmem:[#allocation5 + $0x20] sm:$0xff]   ;;  %v505_v10 = vld [vmem:[#allocation5 + $0x68] sm:$0xff]   ;;  %p590_p10 = scmp.ne.s32.totalorder %s356_s25, %s589_s26  ;;  %p595_p12 = scmp.lt.s32.totalorder %s589_s26, %s589_s26 }
  0x3b   :  { %v513_v11 = vld [vmem:[#allocation2 + $0x4] ss:$8 sps:$4 sm:$0xff]   ;;  %v507_v14 = vld [vmem:[#allocation5 + $0x70] sm:$0xff]   ;;  %v509_v16 = vld [vmem:[#allocation5 + $0x78] sm:$0xff]  }
  0x3c   :  { %v516_v12 = vld [vmem:[#allocation2 + $0x24] ss:$8 sps:$4 sm:$0xff]   ;;  %265 = vmatprep.mubr.bf16.mxu0 %v513_v11  ;;  %v508_v15 = vld [vmem:[#allocation5 + $0x30] sm:$0xff]   ;;  %v510_v17 = vld [vmem:[#allocation5 + $0x38] sm:$0xff]   ;;  %p596_p13 = por %p595_p12, %p594_p11 }
  0x3d   :  { %434 = vmatpush3.bf16.msra.mxu0 %v498_v3  ;;  %480 = vmatpush3.bf16.msra.mxu1 %v498_v3  ;;  %v506_v13 = vld [vmem:[#allocation5 + $0x28] sm:$0xff]   ;;  %v517_v20 = vld [vmem:[#allocation2 + $0x14] ss:$8 sps:$4 sm:$0xff]   ;;  %v521_v22 = vld [vmem:[#allocation2 + $0x10] ss:$8 sps:$4 sm:$0xff]  }
  0x3e   :  { %435 = vmatprep.subr.bf16.mxu0 %v499_v4  ;;  %473 = vmatprep.subr.bf16.mxu1 %v499_v4  ;;  %v511_v18 = vld [vmem:[#allocation2] ss:$8 sps:$4 sm:$0xff]   ;;  %v519_v21 = vld [vmem:[#allocation2 + $0x34] ss:$8 sps:$4 sm:$0xff]   ;;  %v522_v23 = vld [vmem:[#allocation2 + $0x30] ss:$8 sps:$4 sm:$0xff]   ;;  %p597_p0 = pnand %p596_p13, %p590_p10 }
  0x3f   :  { %281 = vmatprep.mubr.bf16.mxu1 %v516_v12  ;;  %v514_v19 = vld [vmem:[#allocation2 + $0x20] ss:$8 sps:$4 sm:$0xff]   ;;  %v300_v52 = vld [vmem:[#allocation7 + $0x10] sm:$0xff]  ;;  %v301_v54 = vld [vmem:[#allocation7 + $0x18] sm:$0xff] }
  0x40   :  { %v298_v32 = vld [vmem:[#allocation7] sm:$0xff]  ;;  %v299_v34 = vld [vmem:[#allocation7 + $0x8] sm:$0xff] }
  0x41   :  { %436 = vmatpush3.bf16.msra.mxu0 %v500_v5  ;;  %481 = vmatpush3.bf16.msra.mxu1 %v500_v5 }
  0x42   :  { %437 = vmatprep.subr.bf16.mxu0 %v501_v6  ;;  %474 = vmatprep.subr.bf16.mxu1 %v501_v6 }
  0x45   :  { %438 = vmatpush3.bf16.msra.mxu0 %v502_v7  ;;  %482 = vmatpush3.bf16.msra.mxu1 %v502_v7 }
  0x46   :  { %439 = vmatprep.subr.bf16.mxu0 %v503_v8  ;;  %475 = vmatprep.subr.bf16.mxu1 %v503_v8 }
  0x49   :  { %440 = vmatpush3.bf16.msra.mxu0 %v504_v9  ;;  %483 = vmatpush3.bf16.msra.mxu1 %v504_v9 }
  0x4a   :  { %441 = vmatprep.subr.bf16.mxu0 %v505_v10  ;;  %476 = vmatprep.subr.bf16.mxu1 %v505_v10 }
  0x4d   :  { %442 = vmatpush3.bf16.msra.mxu0 %v506_v13  ;;  %484 = vmatpush3.bf16.msra.mxu1 %v506_v13 }
  0x4e   :  { %443 = vmatprep.subr.bf16.mxu0 %v507_v14  ;;  %477 = vmatprep.subr.bf16.mxu1 %v507_v14 }
  0x51   :  { %444 = vmatpush3.bf16.msra.mxu0 %v508_v15  ;;  %485 = vmatpush3.bf16.msra.mxu1 %v508_v15 }
  0x52   :  { %445 = vmatprep.subr.bf16.mxu0 %v509_v16  ;;  %478 = vmatprep.subr.bf16.mxu1 %v509_v16 }
  0x55   :  { %446 = vmatpush3.bf16.msra.mxu0 %v510_v17  ;;  %486 = vmatpush3.bf16.msra.mxu1 %v510_v17 }
  0x58   :  { %266 = vmatmul.mubr.bf16.vlgmr.msra.gmra.mrb[0].mxu0 %v511_v18  ;;  %282 = vmatmul.mubr.bf16.vlgmr.msra.gmra.mrb[0].mxu1 %v514_v19 }
  0x59   :  { %273 = vmatprep.mubr.bf16.mxu0 %v517_v20  ;;  %289 = vmatprep.mubr.bf16.mxu1 %v519_v21 }
  0x60   :  { %274 = vmatmul.mubr.bf16.gmra.mrb[4].mxu0 %v521_v22  ;;  %290 = vmatmul.mubr.bf16.gmra.mrb[4].mxu1 %v522_v23 }
 0x12b   :  { %v447_v24 = vpop.f32.mrb[0].mxu0  ;;  %v459_v25 = vpop.f32.mrb[0].mxu1 }
 0x12c   :  { %v448_v26 = vpop.f32.mrb[1].mxu0  ;;  %v460_v27 = vpop.f32.mrb[1].mxu1 }
 0x12d   :  { %v449_v28 = vadd.f32 %v448_v26, %v447_v24  ;;  %v461_v29 = vadd.f32 %v460_v27, %v459_v25  ;;  %v450_v30 = vpop.f32.mrb[2].mxu0  ;;  %v462_v31 = vpop.f32.mrb[2].mxu1 }
 0x12e   :  { %v451_v33 = vpop.f32.mrb[3].mxu0  ;;  %v463_v35 = vpop.f32.mrb[3].mxu1 }
 0x12f   :  { %v452_v36 = vadd.f32 %v451_v33, %v450_v30  ;;  %v464_v37 = vadd.f32 %v463_v35, %v462_v31  ;;  %v302_v38 = vadd.f32 %v449_v28, %v298_v32  ;;  %v306_v39 = vadd.f32 %v461_v29, %v298_v32 }
 0x131   :  { %v303_v40 = vadd.f32 %v452_v36, %v299_v34  ;;  %v307_v41 = vadd.f32 %v464_v37, %v299_v34 }
 0x133   :  { %v411_v42 = vpack.c.bf16 %v303_v40, %v302_v38  ;;  %v421_v43 = vpack.c.bf16 %v307_v41, %v306_v39  ;;  %v453_v44 = vpop.f32.mrb[4].mxu0  ;;  %v465_v45 = vpop.f32.mrb[4].mxu1 }
 0x134   :  { %v454_v46 = vpop.f32.mrb[5].mxu0  ;;  %v466_v47 = vpop.f32.mrb[5].mxu1 }
 0x135   :  { %412 = vst [vmem:[#allocation8] sm:$0xff] %v411_v42   ;;  %429 = vst [vmem:[#allocation8 + $0x10] sm:$0xff] %v421_v43   ;;  %v455_v48 = vadd.f32 %v454_v46, %v453_v44  ;;  %v467_v49 = vadd.f32 %v466_v47, %v465_v45  ;;  %v456_v50 = vpop.f32.mrb[6].mxu0  ;;  %v468_v51 = vpop.f32.mrb[6].mxu1 }
 0x136   :  { %v457_v53 = vpop.f32.mrb[7].mxu0  ;;  %v469_v55 = vpop.f32.mrb[7].mxu1 }
 0x137   :  { %v458_v56 = vadd.f32 %v457_v53, %v456_v50  ;;  %v470_v57 = vadd.f32 %v469_v55, %v468_v51  ;;  %v304_v58 = vadd.f32 %v455_v48, %v300_v52  ;;  %v308_v59 = vadd.f32 %v467_v49, %v300_v52 }
 0x139   :  { %v305_v60 = vadd.f32 %v458_v56, %v301_v54  ;;  %v309_v61 = vadd.f32 %v470_v57, %v301_v54 }
 0x13b   :  { %v416_v62 = vpack.c.bf16 %v305_v60, %v304_v58  ;;  %v426_v63 = vpack.c.bf16 %v309_v61, %v308_v59 }
 0x13d   :  { %428 = vst [vmem:[#allocation8 + $0x8] sm:$0xff] %v416_v62   ;;  %430 = vst [vmem:[#allocation8 + $0x18] sm:$0xff] %v426_v63  }
 0x13e   :  { %600 = shalt.err (!%p597_p0)
}
 0x13f   :  { %s601_s29 = scalar_lea.hbm %s702_s3, 512 }
 0x140   :  { %p602_p1 = scmp.ne.s32.totalorder %s702_s3, %s601_s29  ;;  %p605_p2 = scmp.lt.u32.totalorder %s601_s29, %s702_s3 }
 0x142   :  { %p607_p3 = pnand %p605_p2, %p602_p1 }
 0x144   :  { %610 = shalt.err (!%p607_p3)
}
 0x145   :  { %361 = dma.vmem_to_hbm [thread:$0]  %s356_s25, 512, %s702_s3, [#allocation4], %s618_s22, %s618_s22, %s619_s23  }
 0x146   :  { %615 = dma.done.wait [#allocation4], 512  }
 0x147   :  { %616 = vsyncadd [#allocation4], 4294966784 }
 0x148   :  { %365 = vsyncpa [#allocation3], 1 }
 0x149   :  { %366 = vsyncpa [#allocation6], 1 }
 0x14a   :  { %367 = vsyncpa [#allocation4], 1 }

</bundles_post_ra>
